<compile_context>
chip_gen: v7x
topology: tpu7x:2x2x1
jax: 0.10.0
libtpu: 0.0.40
codegen_flags: <defaults>
</compile_context>

<pallas_src>
import functools
import math

import jax
import jax.numpy as jnp
from jax import lax
from jax.experimental import pallas as pl
from jax.experimental.pallas import tpu as pltpu


_LABEL_SENTINEL = -0x7FFFFFFF  # must never collide with a real (non-negative) label


def _lifted_rows_kernel(x_ref, xt_ref, tcol_ref, trow_ref, rowsq_ref, out_ref, *,
                        margin, n, tm, chunk, num_chunks, pad_e_sum):
    """One (TM, d) row tile of anchors vs all N columns, processed in chunks."""
    i = pl.program_id(0)

    x = x_ref[...]            # (TM, d_pad) bf16 anchor rows (hoisted out of the loop)
    t_col = tcol_ref[...]     # (TM, 1) int32 anchor labels

    zero = jnp.float32(0.0)
    margin_f = jnp.float32(margin)

    def chunk_body(c, carry):
        total_acc, pos_acc = carry
        xt_c = xt_ref[c]       # (d_pad, C) bf16 resident x^T column chunk
        t_row_c = trow_ref[c]  # (1, C) int32 labels for this column chunk
        # MXU matmul with f32 accumulation; no in-kernel transpose.
        sim = jnp.dot(x, xt_c, preferred_element_type=jnp.float32)   # (TM, C)
        e = jnp.exp(sim - margin_f)
        # Sentinel labels on padded columns never equal a real label, so no
        # explicit column-validity mask is needed.
        pos = t_col == t_row_c
        total_acc = total_acc + jnp.sum(e, axis=1, keepdims=True)
        pos_acc = pos_acc + jnp.sum(jnp.where(pos, e, zero), axis=1, keepdims=True)
        return total_acc, pos_acc

    init = (jnp.zeros((tm, 1), jnp.float32), jnp.zeros((tm, 1), jnp.float32))
    if num_chunks == 1:
        total_e_row, pos_e_row = chunk_body(0, init)
    else:
        total_e_row, pos_e_row = lax.fori_loop(0, num_chunks, chunk_body, init)

    # Padded columns have sim == 0 exactly (zero-padded x), so their total
    # contribution is the static constant pad_e_sum: subtract instead of masking.
    total_e_row = total_e_row - jnp.float32(pad_e_sum)

    # Diagonal (self-similarity) from the wrapper-precomputed per-row ||x_i||^2.
    diag_e = jnp.exp(rowsq_ref[...] - margin_f)        # (TM, 1)
    pos_e_excl = pos_e_row - diag_e                    # positives w/o the diagonal
    neg_e_row = total_e_row - pos_e_row                # negatives by subtraction

    row_valid = (lax.broadcasted_iota(jnp.int32, (tm, 1), 0) + i * tm) < n

    # Reference semantics: pos_loss = log(sum(-exp(pos - margin))) == log(-sum)
    # which is NaN by construction; reproduced exactly.
    log_terms = jnp.log(-pos_e_excl) + jnp.log(neg_e_row)
    loss_part = jnp.sum(jnp.where(row_valid, log_terms, zero))

    # Lane-dense (8, 128) per-tile partial: value at sublane 0, lane 0.
    sub = lax.broadcasted_iota(jnp.int32, (8, 128), 0)
    lane = lax.broadcasted_iota(jnp.int32, (8, 128), 1)
    out_ref[0] = jnp.where(jnp.logical_and(sub == 0, lane == 0), loss_part, zero)


def _vmem_limit_bytes():
    """Generation-aware VMEM limit: ~38 MiB on v7x (64 MiB/TC), ~77 MiB on v5e/v6e."""
    try:
        cap = int(pltpu.get_tpu_info().vmem_capacity_bytes)
    except Exception:  # conservative fallback
        cap = 128 * 1024 * 1024
    return min((cap * 6) // 10, 100 * 1024 * 1024)


def lifted_structure_loss(inputs, targets, *, alpha=10, beta=2, margin=0.5,
                          hard_mining=None, block_rows=256, col_chunk=2048):
    # TODO(synk): hard_mining branch (data-dependent masked_select lengths per
    # row) has no clean static-shape Pallas equivalent; only the default
    # hard_mining=None path is implemented.
    assert hard_mining is None
    del alpha, beta  # unused by the reference default path

    n, d = inputs.shape
    tm = block_rows            # 256 fills the 256x256 MXU on v6e/v7x; use 128 on v5e
    assert tm % 128 == 0, "block_rows must be a multiple of 128"
    assert col_chunk % 128 == 0

    # Pad N to a multiple of TM (and of the column chunk when chunking) and d
    # to a multiple of 128 for the MXU contraction.
    n_pad = ((n + tm - 1) // tm) * tm
    if n_pad > col_chunk:
        step = math.lcm(tm, col_chunk)
        n_pad = ((n + step - 1) // step) * step
    chunk = min(n_pad, col_chunk)
    num_chunks = n_pad // chunk
    num_tiles = n_pad // tm
    d_pad = ((d + 127) // 128) * 128
    # TODO(synk): very large n where the resident x^T no longer fits VMEM would
    # need a column-streamed (second 'arbitrary' grid axis) fallback path.

    x32 = inputs.astype(jnp.float32)
    t = targets.astype(jnp.int32)
    nf = jnp.float32(n)

    # bf16 MXU operands (f32 accumulation in-kernel); zero padding keeps padded
    # rows/columns of `sim` exactly zero.
    xb = jnp.zeros((n_pad, d_pad), jnp.bfloat16).at[:n, :d].set(
        inputs.astype(jnp.bfloat16))
    # One-time wrapper-side transpose + chunk split -> NN matmul in the kernel
    # with leading-axis (statically shaped) chunk selection.
    xt3 = jnp.transpose(xb).reshape(d_pad, num_chunks, chunk).transpose(1, 0, 2)

    t_pad = jnp.full((n_pad,), jnp.int32(_LABEL_SENTINEL)).at[:n].set(t)
    t_col = t_pad.reshape(n_pad, 1)
    t_row3 = t_pad.reshape(num_chunks, 1, chunk)

    # Per-row ||x_i||^2 (consistent with the bf16 kernel operands), once.
    rowsq = jnp.sum(xb.astype(jnp.float32) ** 2, axis=1, keepdims=True)  # (n_pad,1)

    kernel = functools.partial(
        _lifted_rows_kernel,
        margin=float(margin), n=n, tm=tm, chunk=chunk, num_chunks=num_chunks,
        pad_e_sum=float(n_pad - n) * math.exp(-float(margin)),
    )

    cost = pl.CostEstimate(
        flops=2 * n_pad * n_pad * d_pad,
        transcendentals=n_pad * n_pad + 2 * n_pad,
        bytes_accessed=(xb.size * 2 + xt3.size * 2
                        + 4 * (t_col.size + t_row3.size + rowsq.size)
                        + num_tiles * 8 * 128 * 4),
    )

    out = pl.pallas_call(
        kernel,
        out_shape=jax.ShapeDtypeStruct((num_tiles, 8, 128), jnp.float32),
        grid=(num_tiles,),
        in_specs=[
            pl.BlockSpec((tm, d_pad), lambda i: (i, 0)),              # anchor rows
            pl.BlockSpec((num_chunks, d_pad, chunk), lambda i: (0, 0, 0),
                         pipeline_mode=pl.Buffered(1)),               # resident x^T
            pl.BlockSpec((tm, 1), lambda i: (i, 0)),                  # anchor labels
            pl.BlockSpec((num_chunks, 1, chunk), lambda i: (0, 0, 0),
                         pipeline_mode=pl.Buffered(1)),               # all labels
            pl.BlockSpec((tm, 1), lambda i: (i, 0)),                  # ||x_i||^2
        ],
        out_specs=pl.BlockSpec((1, 8, 128), lambda i: (i, 0, 0)),
        compiler_params=pltpu.CompilerParams(
            dimension_semantics=("parallel",),   # megacore-shard row tiles on v7x
            vmem_limit_bytes=_vmem_limit_bytes(),
        ),
        cost_estimate=cost,
    )(xb, xt3, t_col, t_row3, rowsq)

    loss = jnp.sum(out) / nf   # only sublane 0 / lane 0 of each tile is nonzero

    # ---- pos_d / neg_d and pair counts: O(n*d) wrapper math on the original
    # f32 inputs (algebraically identical to the reference's masked means). ----
    ts = jnp.sort(t)
    left = jnp.searchsorted(ts, t, side="left")
    right = jnp.searchsorted(ts, t, side="right")
    same_total = jnp.sum(right - left).astype(jnp.float32)   # sum_c count_c^2
    pos_cnt = same_total - nf                                 # same-label, no diag
    neg_cnt = nf * nf - same_total                            # different-label pairs

    col_sum = jnp.sum(x32, axis=0)
    total_sim_sum = jnp.dot(col_sum, col_sum)                 # sum_{i,j} x_i . x_j
    class_sums = jax.ops.segment_sum(x32, left, num_segments=n)
    same_label_sum = jnp.sum(class_sums * class_sums)         # same-label incl diag
    diag_sum = jnp.sum(x32 * x32)

    pos_d = (same_label_sum - diag_sum) / pos_cnt
    neg_d = (total_sim_sum - same_label_sum) / neg_cnt
    prec = jnp.float32(0.0)   # hard_mining is None -> c == 0 in the reference
    return loss, prec, pos_d, neg_d


if __name__ == "__main__":
    key = jax.random.PRNGKey(0)
    n, d = 8, 32  # 2 classes x 4 instances (balanced, as the reference assumes)
    inputs = jax.random.normal(key, (n, d), dtype=jnp.float32)
    targets = jnp.array([0, 0, 0, 0, 1, 1, 1, 1], dtype=jnp.int32)

    loss, prec, pos_d, neg_d = lifted_structure_loss(inputs, targets)
    jax.block_until_ready((loss, prec, pos_d, neg_d))
    print("KERNEL_OK")
</pallas_src>

<mosaic_0001>
module attributes {stable_mosaic.version = 11 : i64} {
  func.func @_lifted_rows_kernel(%arg0: i32, %arg1: memref<256x128xbf16, #tpu.memory_space<vmem>>, %arg2: memref<1x128x256xbf16, #tpu.memory_space<vmem>>, %arg3: memref<256x1xi32, #tpu.memory_space<vmem>>, %arg4: memref<1x1x256xi32, #tpu.memory_space<vmem>>, %arg5: memref<256x1xf32, #tpu.memory_space<vmem>>, %arg6: memref<1x8x128xf32, #tpu.memory_space<vmem>>) attributes {dimension_semantics = [#tpu.dimension_semantics<parallel>], iteration_bounds = array<i64: 1>, scalar_prefetch = 0 : i64, scratch_operands = 0 : i64, tpu.core_type = #tpu.core_type<tc>, window_params = [{transform_indices = @transform_0, window_bounds = array<i64: 256, 128>}, {pipeline_mode = #tpu.pipeline_mode<synchronous>, transform_indices = @transform_1, window_bounds = array<i64: 1, 128, 256>}, {transform_indices = @transform_2, window_bounds = array<i64: 256, 1>}, {pipeline_mode = #tpu.pipeline_mode<synchronous>, transform_indices = @transform_3, window_bounds = array<i64: 1, 1, 256>}, {transform_indices = @transform_4, window_bounds = array<i64: 256, 1>}, {transform_indices = @transform_5, window_bounds = array<i64: 1, 8, 128>}]} {
    %c0 = arith.constant 0 : index
    %c0_0 = arith.constant 0 : index
    %0 = vector.load %arg1[%c0, %c0_0] : memref<256x128xbf16, #tpu.memory_space<vmem>>, vector<256x128xbf16>
    %c0_1 = arith.constant 0 : index
    %c0_2 = arith.constant 0 : index
    %1 = vector.load %arg3[%c0_1, %c0_2] : memref<256x1xi32, #tpu.memory_space<vmem>>, vector<256x1xi32>
    %cst = arith.constant 0.000000e+00 : f32
    %2 = vector.broadcast %cst : f32 to vector<256x1xf32>
    %cst_3 = arith.constant 0.000000e+00 : f32
    %3 = vector.broadcast %cst_3 : f32 to vector<256x1xf32>
    %c0_4 = arith.constant 0 : index
    %c0_5 = arith.constant 0 : index
    %c0_6 = arith.constant 0 : index
    %4 = vector.load %arg2[%c0_4, %c0_5, %c0_6] : memref<1x128x256xbf16, #tpu.memory_space<vmem>>, vector<1x128x256xbf16>
    %5 = vector.shape_cast %4 : vector<1x128x256xbf16> to vector<128x256xbf16>
    %c0_7 = arith.constant 0 : index
    %c0_8 = arith.constant 0 : index
    %c0_9 = arith.constant 0 : index
    %6 = vector.load %arg4[%c0_7, %c0_8, %c0_9] : memref<1x1x256xi32, #tpu.memory_space<vmem>>, vector<1x1x256xi32>
    %7 = vector.shape_cast %6 : vector<1x1x256xi32> to vector<1x256xi32>
    %cst_10 = arith.constant dense<0.000000e+00> : vector<256x256xf32>
    %8 = tpu.matmul %0, %5, %cst_10 {dimension_numbers = #tpu.dot_dimension_numbers<[1], [0], [0], [1], [0, 0, 1, 1], [], []>} : vector<256x128xbf16>, vector<128x256xbf16>, vector<256x256xf32> -> vector<256x256xf32>
    %cst_11 = arith.constant 5.000000e-01 : f32
    %9 = vector.broadcast %cst_11 : f32 to vector<256x256xf32>
    %10 = arith.subf %8, %9 : vector<256x256xf32>
    %11 = math.exp %10 : vector<256x256xf32>
    %12 = vector.broadcast %1 : vector<256x1xi32> to vector<256x256xi32>
    %13 = vector.broadcast %7 : vector<1x256xi32> to vector<256x256xi32>
    %14 = arith.cmpi eq, %12, %13 : vector<256x256xi32>
    %cst_12 = arith.constant dense<0.000000e+00> : vector<256xf32>
    %15 = vector.multi_reduction <add>, %11, %cst_12 [1] : vector<256x256xf32> to vector<256xf32>
    %16 = vector.shape_cast %15 : vector<256xf32> to vector<256x1xf32>
    %17 = arith.addf %2, %16 : vector<256x1xf32>
    %cst_13 = arith.constant 0.000000e+00 : f32
    %18 = vector.broadcast %cst_13 : f32 to vector<256x256xf32>
    %19 = arith.select %14, %11, %18 : vector<256x256xi1>, vector<256x256xf32>
    %cst_14 = arith.constant dense<0.000000e+00> : vector<256xf32>
    %20 = vector.multi_reduction <add>, %19, %cst_14 [1] : vector<256x256xf32> to vector<256xf32>
    %21 = vector.shape_cast %20 : vector<256xf32> to vector<256x1xf32>
    %22 = arith.addf %3, %21 : vector<256x1xf32>
    %cst_15 = arith.constant 150.419601 : f32
    %23 = vector.broadcast %cst_15 : f32 to vector<256x1xf32>
    %24 = arith.subf %17, %23 : vector<256x1xf32>
    %c0_16 = arith.constant 0 : index
    %c0_17 = arith.constant 0 : index
    %25 = vector.load %arg5[%c0_16, %c0_17] : memref<256x1xf32, #tpu.memory_space<vmem>>, vector<256x1xf32>
    %cst_18 = arith.constant 5.000000e-01 : f32
    %26 = vector.broadcast %cst_18 : f32 to vector<256x1xf32>
    %27 = arith.subf %25, %26 : vector<256x1xf32>
    %28 = math.exp %27 : vector<256x1xf32>
    %29 = arith.subf %22, %28 : vector<256x1xf32>
    %30 = arith.subf %24, %22 : vector<256x1xf32>
    %31 = tpu.iota {dimensions = array<i32: 0>} : vector<256x1xi32>
    %c256_i32 = arith.constant 256 : i32
    %32 = arith.muli %arg0, %c256_i32 : i32
    %33 = vector.broadcast %32 : i32 to vector<256x1xi32>
    %34 = arith.addi %31, %33 : vector<256x1xi32>
    %c8_i32 = arith.constant 8 : i32
    %35 = vector.broadcast %c8_i32 : i32 to vector<256x1xi32>
    %36 = arith.cmpi slt, %34, %35 : vector<256x1xi32>
    %cst_19 = arith.constant 0.000000e+00 : f32
    %37 = vector.broadcast %cst_19 : f32 to vector<256x1xf32>
    %38 = arith.subf %37, %29 : vector<256x1xf32>
    %39 = math.log %38 : vector<256x1xf32>
    %40 = math.log %30 : vector<256x1xf32>
    %41 = arith.addf %39, %40 : vector<256x1xf32>
    %cst_20 = arith.constant 0.000000e+00 : f32
    %42 = vector.broadcast %cst_20 : f32 to vector<256x1xf32>
    %43 = arith.select %36, %41, %42 : vector<256x1xi1>, vector<256x1xf32>
    %44 = vector.shape_cast %43 : vector<256x1xf32> to vector<1x256x1xf32>
    %cst_21 = arith.constant dense<0.000000e+00> : vector<1xf32>
    %45 = vector.multi_reduction <add>, %44, %cst_21 [1, 2] : vector<1x256x1xf32> to vector<1xf32>
    %46 = vector.shape_cast %45 : vector<1xf32> to vector<1x1x1xf32>
    %47 = vector.extract %46[0, 0, 0] : f32 from vector<1x1x1xf32>
    %48 = tpu.iota {dimensions = array<i32: 0>} : vector<8x128xi32>
    %49 = tpu.iota {dimensions = array<i32: 1>} : vector<8x128xi32>
    %c0_i32 = arith.constant 0 : i32
    %50 = vector.broadcast %c0_i32 : i32 to vector<8x128xi32>
    %51 = arith.cmpi eq, %48, %50 : vector<8x128xi32>
    %c0_i32_22 = arith.constant 0 : i32
    %52 = vector.broadcast %c0_i32_22 : i32 to vector<8x128xi32>
    %53 = arith.cmpi eq, %49, %52 : vector<8x128xi32>
    %54 = arith.andi %51, %53 : vector<8x128xi1>
    %cst_23 = arith.constant 0.000000e+00 : f32
    %55 = vector.broadcast %47 : f32 to vector<8x128xf32>
    %56 = vector.broadcast %cst_23 : f32 to vector<8x128xf32>
    %57 = arith.select %54, %55, %56 : vector<8x128xi1>, vector<8x128xf32>
    %c0_24 = arith.constant 0 : index
    %c0_25 = arith.constant 0 : index
    %c0_26 = arith.constant 0 : index
    %58 = vector.load %arg6[%c0_24, %c0_25, %c0_26] : memref<1x8x128xf32, #tpu.memory_space<vmem>>, vector<1x8x128xf32>
    %59 = vector.shape_cast %58 : vector<1x8x128xf32> to vector<8x128xf32>
    %60 = vector.shape_cast %57 : vector<8x128xf32> to vector<1x8x128xf32>
    tpu.vector_store %arg6[%c0_24, %c0_25, %c0_26], %60 {strides = array<i32>} : memref<1x8x128xf32, #tpu.memory_space<vmem>>, vector<1x8x128xf32>,
    return
  }
  func.func @transform_0(%arg0: i32) -> (i32, i32) {
    %c0_i32 = arith.constant 0 : i32
    %c0_i32_0 = arith.constant 0 : i32
    return %arg0, %c0_i32 : i32, i32
  }
  func.func @transform_1(%arg0: i32) -> (i32, i32, i32) {
    %c0_i32 = arith.constant 0 : i32
    %c0_i32_0 = arith.constant 0 : i32
    %c0_i32_1 = arith.constant 0 : i32
    %c0_i32_2 = arith.constant 0 : i32
    return %c0_i32, %c0_i32_0, %c0_i32_1 : i32, i32, i32
  }
  func.func @transform_2(%arg0: i32) -> (i32, i32) {
    %c0_i32 = arith.constant 0 : i32
    %c0_i32_0 = arith.constant 0 : i32
    return %arg0, %c0_i32 : i32, i32
  }
  func.func @transform_3(%arg0: i32) -> (i32, i32, i32) {
    %c0_i32 = arith.constant 0 : i32
    %c0_i32_0 = arith.constant 0 : i32
    %c0_i32_1 = arith.constant 0 : i32
    %c0_i32_2 = arith.constant 0 : i32
    return %c0_i32, %c0_i32_0, %c0_i32_1 : i32, i32, i32
  }
  func.func @transform_4(%arg0: i32) -> (i32, i32) {
    %c0_i32 = arith.constant 0 : i32
    %c0_i32_0 = arith.constant 0 : i32
    return %arg0, %c0_i32 : i32, i32
  }
  func.func @transform_5(%arg0: i32) -> (i32, i32, i32) {
    %c0_i32 = arith.constant 0 : i32
    %c0_i32_0 = arith.constant 0 : i32
    %c0_i32_1 = arith.constant 0 : i32
    return %arg0, %c0_i32, %c0_i32_0 : i32, i32, i32
  }
}

</mosaic_0001>

<bundles_post_ra>
// kernel: tpu_custom_call.1
= control target key start
LH: loop header
LB: loop body
LE: loop exit
PB: predicated region body
PF: predicated region fallthrough
CT: control target
= control target key end

     0   :  { %10 = vsyncpa [#allocation3], 0  ;;  %s2389_s0 = inlined_call_operand.hbm [shape: bf16[256,128], index: 0, kind: input, shape index: {}]   ;;  %s2390_s1 = inlined_call_operand.hbm [shape: bf16[1,128,256], index: 1, kind: input, shape index: {}]   ;;  %s2391_s2 = inlined_call_operand.hbm [shape: s32[256,1], index: 2, kind: input, shape index: {}]   ;;  %s2392_s3 = inlined_call_operand.hbm [shape: s32[1,1,256], index: 3, kind: input, shape index: {}]   ;;  %s2393_s4 = inlined_call_operand.hbm [shape: f32[256,1], index: 4, kind: input, shape index: {}]   ;;  %s2394_s5 = inlined_call_operand.hbm [shape: f32[1,8,128], index: 5, kind: output, shape index: {}]  }
   0x1   :  { %11 = vsyncpa [#allocation6], 0 }
   0x2   :  { %12 = vsyncpa [#allocation9], 0 }
   0x3   :  { %13 = vsyncpa [#allocation4], 0  ;;  %s2243_s18 = smov [#allocation5]   ;;  %s2103_s22 = scalar_lea.hbm %s2390_s1, 2048 }
   0x4   :  { %s31_s19 = sshll.u32 %s2243_s18, 4  ;;  %p2104_p0 = scmp.ne.s32.totalorder %s2390_s1, %s2103_s22  ;;  %s32_s19 = int_to_ptr.vmem [resolvable:$true] %s31_s19 }
   0x5   :  { %p2107_p1 = scmp.lt.u32.totalorder %s2103_s22, %s2390_s1 }
   0x7   :  { %p2109_p2 = pnand %p2107_p1, %p2104_p0 }
   0x9   :  { %2112 = shalt.err (!%p2109_p2)
}
   0xa   :  { %s2113_s27 = scalar_lea.vmem %s32_s19, 2048  ;;  %p2118_p4 = scmp.lt.s32.totalorder %s32_s19, %s32_s19 }
   0xb   :  { %p2114_p3 = scmp.ne.s32.totalorder %s32_s19, %s2113_s27  ;;  %p2119_p5 = scmp.lt.s32.totalorder %s2113_s27, %s2113_s27 }
   0xd   :  { %p2120_p6 = por %p2119_p5, %p2118_p4 }
   0xf   :  { %p2121_p7 = pnand %p2120_p6, %p2114_p3 }
  0x11   :  { %2124 = shalt.err (!%p2121_p7)
}
  0x12   :  { %s2244_s28 = smov 128   ;;  %s2245_s29 = smov 8  }
  0x13   :  { %37 = dma.hbm_to_vmem [thread:$0]  %s2390_s1, 2048, %s32_s19, [#allocation6], %s2244_s28, %s2244_s28, %s2245_s29  }
  0x14   :  { %s2246_s7 = smov [#allocation8]   ;;  %s2247_s9 = smov [#allocation2]  }
  0x15   :  { %s56_s8 = sshll.u32 %s2246_s7, 4  ;;  %s19_s10 = sshll.u32 %s2247_s9, 4  ;;  %s57_s8 = int_to_ptr.vmem [resolvable:$true] %s56_s8  ;;  %s20_s10 = int_to_ptr.vmem [resolvable:$true] %s19_s10 }
  0x16   :  { %s2125_s13 = scalar_lea.hbm %s2392_s3, 32 }
  0x17   :  { %p2126_p8 = scmp.ne.s32.totalorder %s2392_s3, %s2125_s13  ;;  %p2129_p9 = scmp.lt.u32.totalorder %s2125_s13, %s2392_s3 }
  0x19   :  { %p2131_p10 = pnand %p2129_p9, %p2126_p8 }
  0x1b   :  { %2134 = shalt.err (!%p2131_p10)
}
  0x1c   :  { %s2135_s1 = scalar_lea.vmem %s57_s8, 32  ;;  %p2140_p12 = scmp.lt.s32.totalorder %s57_s8, %s57_s8 }
  0x1d   :  { %p2136_p11 = scmp.ne.s32.totalorder %s57_s8, %s2135_s1  ;;  %p2141_p13 = scmp.lt.s32.totalorder %s2135_s1, %s2135_s1 }
  0x1f   :  { %p2142_p0 = por %p2141_p13, %p2140_p12 }
  0x21   :  { %p2143_p1 = pnand %p2142_p0, %p2136_p11 }
  0x23   :  { %2146 = shalt.err (!%p2143_p1)
}
  0x24   :  { %59 = dma.hbm_to_vmem [thread:$0]  %s2392_s3, 32, %s57_s8, [#allocation9]  }
  0x25   :  { %s2147_s22 = scalar_lea.hbm %s2389_s0, 2048 }
  0x26   :  { %p2148_p2 = scmp.ne.s32.totalorder %s2389_s0, %s2147_s22  ;;  %p2151_p3 = scmp.lt.u32.totalorder %s2147_s22, %s2389_s0 }
  0x28   :  { %p2153_p4 = pnand %p2151_p3, %p2148_p2 }
  0x2a   :  { %2156 = shalt.err (!%p2153_p4)
}
  0x2b   :  { %s2157_s27 = scalar_lea.vmem %s20_s10, 2048  ;;  %p2162_p6 = scmp.lt.s32.totalorder %s20_s10, %s20_s10 }
  0x2c   :  { %p2158_p5 = scmp.ne.s32.totalorder %s20_s10, %s2157_s27  ;;  %p2163_p7 = scmp.lt.s32.totalorder %s2157_s27, %s2157_s27 }
  0x2e   :  { %p2164_p8 = por %p2163_p7, %p2162_p6 }
  0x30   :  { %p2165_p9 = pnand %p2164_p8, %p2158_p5 }
  0x32   :  { %2168 = shalt.err (!%p2165_p9)
}
  0x33   :  { %s2248_s3 = smov 64   ;;  %s2249_s30 = smov 4  }
  0x34   :  { %25 = dma.hbm_to_vmem [thread:$0]  %s2389_s0, 2048, %s20_s10, [#allocation3], %s2248_s3, %s2248_s3, %s2249_s30  }
  0x35   :  { %s2250_s8 = smov [#allocation7]   ;;  %s2251_s11 = smov [#allocation10]  }
  0x36   :  { %s43_s9 = sshll.u32 %s2250_s8, 4  ;;  %s65_s12 = sshll.u32 %s2251_s11, 4  ;;  %s44_s9 = int_to_ptr.vmem [resolvable:$true] %s43_s9  ;;  %s66_s12 = int_to_ptr.vmem [resolvable:$true] %s65_s12 }
  0x37   :  { %s2169_s15 = scalar_lea.hbm %s2391_s2, 4096 }
  0x38   :  { %p2170_p10 = scmp.ne.s32.totalorder %s2391_s2, %s2169_s15  ;;  %p2173_p11 = scmp.lt.u32.totalorder %s2169_s15, %s2391_s2 }
  0x3a   :  { %p2175_p12 = pnand %p2173_p11, %p2170_p10 }
  0x3c   :  { %2178 = shalt.err (!%p2175_p12)
}
  0x3d   :  { %s2179_s0 = scalar_lea.vmem %s44_s9, 4096  ;;  %p2184_p0 = scmp.lt.s32.totalorder %s44_s9, %s44_s9 }
  0x3e   :  { %p2180_p13 = scmp.ne.s32.totalorder %s44_s9, %s2179_s0  ;;  %p2185_p1 = scmp.lt.s32.totalorder %s2179_s0, %s2179_s0 }
  0x40   :  { %p2186_p2 = por %p2185_p1, %p2184_p0 }
  0x42   :  { %p2187_p3 = pnand %p2186_p2, %p2180_p13 }
  0x44   :  { %2190 = shalt.err (!%p2187_p3)
}
  0x45   :  { %49 = dma.hbm_to_vmem [thread:$0]  %s2391_s2, 4096, %s44_s9, [#allocation6], %s2244_s28, %s2244_s28, %s2245_s29  }
  0x46   :  { %s2191_s22 = scalar_lea.hbm %s2393_s4, 4096 }
  0x47   :  { %p2192_p4 = scmp.ne.s32.totalorder %s2393_s4, %s2191_s22  ;;  %p2195_p5 = scmp.lt.u32.totalorder %s2191_s22, %s2393_s4 }
  0x49   :  { %p2197_p6 = pnand %p2195_p5, %p2192_p4 }
  0x4b   :  { %2200 = shalt.err (!%p2197_p6)
}
  0x4c   :  { %s2201_s27 = scalar_lea.vmem %s66_s12, 4096  ;;  %p2206_p8 = scmp.lt.s32.totalorder %s66_s12, %s66_s12 }
  0x4d   :  { %p2202_p7 = scmp.ne.s32.totalorder %s66_s12, %s2201_s27  ;;  %p2207_p9 = scmp.lt.s32.totalorder %s2201_s27, %s2201_s27 }
  0x4f   :  { %p2208_p10 = por %p2207_p9, %p2206_p8 }
  0x51   :  { %p2209_p11 = pnand %p2208_p10, %p2202_p7 }
  0x53   :  { %2212 = shalt.err (!%p2209_p11)
}
  0x54   :  { %71 = dma.hbm_to_vmem [thread:$0]  %s2393_s4, 4096, %s66_s12, [#allocation9], %s2244_s28, %s2244_s28, %s2245_s29  }
  0x55   :  { %2235 = dma.done.wait [#allocation3], 2048  }
  0x56   :  { %2236 = vsyncadd [#allocation3], 4294965248 }
  0x57   :  { %2237 = dma.done.wait [#allocation6], 6144  }
  0x58   :  { %2238 = vsyncadd [#allocation6], 4294961152 }
  0x59   :  { %2239 = dma.done.wait [#allocation9], 4128  }
  0x5a   :  { %2240 = vsyncadd [#allocation9], 4294963168  ;;  %v2252_v0 = vmov 0   ;;  %v2053_v1 = vld [vmem:[#allocation5 + $0x4] ss:$8 sps:$4 sm:$0xff]   ;;  %v2081_v22 = vld [vmem:[#allocation2 + $0x10] sm:$0xff]   ;;  %v826_v30 = vlaneseq }
  0x5b   :  { %377 = vmatprep.mubr.bf16.mxu0 %v2252_v0  ;;  %2052 = vset.pattern.permute.xlu0 %v2252_v0  ;;  %v2055_v2 = vld [vmem:[#allocation5] ss:$8 sps:$4 sm:$0xff]   ;;  %v2056_v3 = vld [vmem:[#allocation5 + $0x14] ss:$8 sps:$4 sm:$0xff]   ;;  %v2058_v4 = vld [vmem:[#allocation5 + $0x10] ss:$8 sps:$4 sm:$0xff]  }
  0x5c   :  { %457 = vmatprep.mubr.bf16.mxu1 %v2252_v0  ;;  %345 = vmatprep.subr.bf16.mxu0 %v2053_v1  ;;  %v2059_v5 = vld [vmem:[#allocation5 + $0x24] ss:$8 sps:$4 sm:$0xff]   ;;  %v2061_v6 = vld [vmem:[#allocation5 + $0x20] ss:$8 sps:$4 sm:$0xff]   ;;  %v2062_v7 = vld [vmem:[#allocation5 + $0x34] ss:$8 sps:$4 sm:$0xff]  }
  0x5d   :  { %2023 = vmatprep.subr.bf16.mxu1 %v2053_v1  ;;  %346 = vmatpush1.bf16.msra.mxu0 %v2055_v2  ;;  %v2064_v8 = vld [vmem:[#allocation5 + $0x30] ss:$8 sps:$4 sm:$0xff]   ;;  %v2065_v9 = vld [vmem:[#allocation5 + $0x44] ss:$8 sps:$4 sm:$0xff]   ;;  %v2067_v11 = vld [vmem:[#allocation5 + $0x40] ss:$8 sps:$4 sm:$0xff]  }
  0x5e   :  { %2031 = vmatpush1.bf16.msra.mxu1 %v2055_v2  ;;  %347 = vmatprep.subr.bf16.mxu0 %v2056_v3  ;;  %v120_v10 = vld [vmem:[#allocation7] sm:$0xff]  ;;  %v2068_v12 = vld [vmem:[#allocation5 + $0x54] ss:$8 sps:$4 sm:$0xff]   ;;  %v2070_v13 = vld [vmem:[#allocation5 + $0x50] ss:$8 sps:$4 sm:$0xff]   ;;  %v2369_v34 = vshrl.u32 %v826_v30, 7 }
  0x5f   :  { %2024 = vmatprep.subr.bf16.mxu1 %v2056_v3  ;;  %731 = vperm.xlu0 %2052, %v120_v10   ;;  %v2071_v14 = vld [vmem:[#allocation5 + $0x64] ss:$8 sps:$4 sm:$0xff]   ;;  %v2073_v15 = vld [vmem:[#allocation5 + $0x60] ss:$8 sps:$4 sm:$0xff]   ;;  %v2074_v16 = vld [vmem:[#allocation5 + $0x74] ss:$8 sps:$4 sm:$0xff]  }
  0x60   :  { %v2076_v17 = vld [vmem:[#allocation5 + $0x70] ss:$8 sps:$4 sm:$0xff]   ;;  %v2077_v18 = vld [vmem:[#allocation2] sm:$0xff]   ;;  %v2079_v20 = vld [vmem:[#allocation2 + $0x8] sm:$0xff]   ;;  %v828_v40 = vsub.s32 0, %v2369_v34  ;;  %v832_v42 = vsub.s32 1, %v2369_v34 }
  0x61   :  { %348 = vmatpush1.bf16.msra.mxu0 %v2058_v4  ;;  %v2078_v19 = vld [vmem:[#allocation2 + $0x40] sm:$0xff]   ;;  %v2080_v21 = vld [vmem:[#allocation2 + $0x48] sm:$0xff]   ;;  %v2082_v23 = vld [vmem:[#allocation2 + $0x50] sm:$0xff]   ;;  %vm1765_vm2 = vcmask 7168   ;;  %vm1840_vm3 = vcmp.eq.s32.totalorder %v2369_v34, 0  ;;  %s2253_s4 = smov [#allocation11]  }
  0x62   :  { %2032 = vmatpush1.bf16.msra.mxu1 %v2058_v4  ;;  %349 = vmatprep.subr.bf16.mxu0 %v2059_v5  ;;  %v2083_v24 = vld [vmem:[#allocation2 + $0x18] sm:$0xff]   ;;  %v2085_v26 = vld [vmem:[#allocation2 + $0x20] sm:$0xff]   ;;  %v2087_v28 = vld [vmem:[#allocation2 + $0x28] sm:$0xff]   ;;  %s1852_s28 = sshll.u32 %s2253_s4, 4  ;;  %s1853_s28 = int_to_ptr.vmem [resolvable:$true] %s1852_s28 }
  0x63   :  { %2025 = vmatprep.subr.bf16.mxu1 %v2059_v5  ;;  %v2084_v25 = vld [vmem:[#allocation2 + $0x58] sm:$0xff]   ;;  %v2086_v27 = vld [vmem:[#allocation2 + $0x60] sm:$0xff]   ;;  %v2088_v29 = vld [vmem:[#allocation2 + $0x68] sm:$0xff]   ;;  %s2213_s30 = scalar_lea.vmem %s1853_s28, 128  ;;  %p2218_p13 = scmp.lt.s32.totalorder %s1853_s28, %s1853_s28 }
  0x64   :  { %v168_v41 = vld [vmem:[#allocation8] sm:$0x3]  ;;  %v2089_v52 = vld [vmem:[#allocation2 + $0x30] sm:$0xff]   ;;  %v2091_v54 = vld [vmem:[#allocation2 + $0x38] sm:$0xff]   ;;  %p2214_p12 = scmp.ne.s32.totalorder %s1853_s28, %s2213_s30  ;;  %p2219_p0 = scmp.lt.s32.totalorder %s2213_s30, %s2213_s30 }
  0x65   :  { %350 = vmatpush1.bf16.msra.mxu0 %v2061_v6  ;;  %v829_v43 = vrot.slane %v168_v41, %v828_v40  ;;  %v833_v44 = vrot.slane %v168_v41, %v832_v42  ;;  %v2090_v53 = vld [vmem:[#allocation2 + $0x70] sm:$0xff]   ;;  %v2092_v55 = vld [vmem:[#allocation2 + $0x78] sm:$0xff]  }
  0x66   :  { %2033 = vmatpush1.bf16.msra.mxu1 %v2061_v6  ;;  %351 = vmatprep.subr.bf16.mxu0 %v2062_v7  ;;  %p2220_p1 = por %p2219_p0, %p2218_p13 }
  0x67   :  { %2026 = vmatprep.subr.bf16.mxu1 %v2062_v7 }
  0x68   :  { %p2221_p2 = pnand %p2220_p1, %p2214_p12 }
  0x69   :  { %352 = vmatpush1.bf16.msra.mxu0 %v2064_v8 }
  0x6a   :  { %2034 = vmatpush1.bf16.msra.mxu1 %v2064_v8  ;;  %353 = vmatprep.subr.bf16.mxu0 %v2065_v9 }
  0x6b   :  { %2027 = vmatprep.subr.bf16.mxu1 %v2065_v9 }
  0x6d   :  { %354 = vmatpush1.bf16.msra.mxu0 %v2067_v11 }
  0x6e   :  { %2035 = vmatpush1.bf16.msra.mxu1 %v2067_v11  ;;  %355 = vmatprep.subr.bf16.mxu0 %v2068_v12 }
  0x6f   :  { %2028 = vmatprep.subr.bf16.mxu1 %v2068_v12 }
  0x71   :  { %356 = vmatpush1.bf16.msra.mxu0 %v2070_v13 }
  0x72   :  { %2036 = vmatpush1.bf16.msra.mxu1 %v2070_v13  ;;  %357 = vmatprep.subr.bf16.mxu0 %v2071_v14 }
  0x73   :  { %2029 = vmatprep.subr.bf16.mxu1 %v2071_v14 }
  0x75   :  { %358 = vmatpush1.bf16.msra.mxu0 %v2073_v15 }
  0x76   :  { %2037 = vmatpush1.bf16.msra.mxu1 %v2073_v15  ;;  %359 = vmatprep.subr.bf16.mxu0 %v2074_v16 }
  0x77   :  { %2030 = vmatprep.subr.bf16.mxu1 %v2074_v16 }
  0x79   :  { %360 = vmatpush1.bf16.msra.mxu0 %v2076_v17 }
  0x7a   :  { %2038 = vmatpush1.bf16.msra.mxu1 %v2076_v17 }
  0x7c   :  { %378 = vmatmul.mubr.bf16.vlgmr.msra.gmra.mrb[0].mxu0 %v2077_v18 }
  0x7d   :  { %387 = vmatprep.mubr.bf16.mxu0 %v2252_v0  ;;  %458 = vmatmul.mubr.bf16.vlgmr.msra.gmra.mrb[0].mxu1 %v2078_v19 }
  0x7e   :  { %467 = vmatprep.mubr.bf16.mxu1 %v2252_v0 }
  0x84   :  { %388 = vmatmul.mubr.bf16.gmra.mrb[4].mxu0 %v2079_v20 }
  0x85   :  { %397 = vmatprep.mubr.bf16.mxu0 %v2252_v0  ;;  %468 = vmatmul.mubr.bf16.gmra.mrb[4].mxu1 %v2080_v21 }
  0x86   :  { %477 = vmatprep.mubr.bf16.mxu1 %v2252_v0 }
  0x8c   :  { %398 = vmatmul.mubr.bf16.gmra.mrb[8].mxu0 %v2081_v22 }
  0x8d   :  { %407 = vmatprep.mubr.bf16.mxu0 %v2252_v0  ;;  %478 = vmatmul.mubr.bf16.gmra.mrb[8].mxu1 %v2082_v23 }
  0x8e   :  { %487 = vmatprep.mubr.bf16.mxu1 %v2252_v0 }
  0x94   :  { %408 = vmatmul.mubr.bf16.gmra.mrb[12].mxu0 %v2083_v24 }
  0x95   :  { %417 = vmatprep.mubr.bf16.mxu0 %v2252_v0  ;;  %488 = vmatmul.mubr.bf16.gmra.mrb[12].mxu1 %v2084_v25 }
  0x96   :  { %497 = vmatprep.mubr.bf16.mxu1 %v2252_v0 }
  0x9c   :  { %418 = vmatmul.mubr.bf16.gmra.mrb[16].mxu0 %v2085_v26  ;;  %v1250_v26 = vld [vmem:[#allocation10] sm:$0xff] }
  0x9d   :  { %427 = vmatprep.mubr.bf16.mxu0 %v2252_v0  ;;  %498 = vmatmul.mubr.bf16.gmra.mrb[16].mxu1 %v2086_v27 }
  0x9e   :  { %507 = vmatprep.mubr.bf16.mxu1 %v2252_v0 }
  0xa4   :  { %428 = vmatmul.mubr.bf16.gmra.mrb[20].mxu0 %v2087_v28 }
  0xa5   :  { %437 = vmatprep.mubr.bf16.mxu0 %v2252_v0  ;;  %508 = vmatmul.mubr.bf16.gmra.mrb[20].mxu1 %v2088_v29 }
  0xa6   :  { %517 = vmatprep.mubr.bf16.mxu1 %v2252_v0 }
  0xac   :  { %438 = vmatmul.mubr.bf16.gmra.mrb[24].mxu0 %v2089_v52 }
  0xad   :  { %518 = vmatmul.mubr.bf16.gmra.mrb[24].mxu1 %v2090_v53  ;;  %447 = vmatprep.mubr.bf16.mxu0 %v2252_v0 }
  0xae   :  { %527 = vmatprep.mubr.bf16.mxu1 %v2252_v0 }
  0xb4   :  { %448 = vmatmul.mubr.bf16.gmra.mrb[28].mxu0 %v2091_v54 }
  0xb5   :  { %528 = vmatmul.mubr.bf16.gmra.mrb[28].mxu1 %v2092_v55 }
  0xde   :  { %v732_v45 = vpop.permute.xlu0 %731 }
  0xdf   :  { %vm834_vm0 = vcmp.eq.s32.totalorder %v732_v45, %v829_v43  ;;  %vm835_vm1 = vcmp.eq.s32.totalorder %v732_v45, %v833_v44 }
 0x14f   :  { %v379_v31 = vpop.f32.mrb[0].mxu0 }
 0x150   :  { %v1895_v32 = vadd.f32 -0.5, %v379_v31  ;;  %v381_v33 = vpop.f32.mrb[1].mxu0  ;;  %v459_v56 = vpop.f32.mrb[0].mxu1 }
 0x151   :  { %v1896_v35 = vadd.f32 -0.5, %v381_v33  ;;  %v383_v36 = vpop.f32.mrb[2].mxu0  ;;  %v461_v58 = vpop.f32.mrb[1].mxu1 }
 0x152   :  { %v602_v37 = vmul.f32 1.442695, %v1895_v32  ;;  %v385_v38 = vpop.f32.mrb[3].mxu0  ;;  %v463_v60 = vpop.f32.mrb[2].mxu1 }
 0x153   :  { %v604_v39 = vmul.f32 1.442695, %v1896_v35  ;;  %v465_v62 = vpop.f32.mrb[3].mxu1  ;;  %v1991_v35 = vadd.f32 -0.5, %v1250_v26 }
 0x154   :  { %2093 = vpow2.f32 %v602_v37 }
 0x155   :  { %2095 = vpow2.f32 %v604_v39  ;;  %v1314_v36 = vmul.f32 1.442695, %v1991_v35 }
 0x157   :  { %v389_v57 = vpop.f32.mrb[4].mxu0  ;;  %2097 = vpow2.f32 %v1314_v36 }
 0x158   :  { %v391_v59 = vpop.f32.mrb[5].mxu0  ;;  %v469_v1 = vpop.f32.mrb[4].mxu1 }
 0x159   :  { %v393_v61 = vpop.f32.mrb[6].mxu0  ;;  %v471_v3 = vpop.f32.mrb[5].mxu1 }
 0x15a   :  { %v395_v63 = vpop.f32.mrb[7].mxu0  ;;  %v473_v5 = vpop.f32.mrb[6].mxu1 }
 0x15b   :  { %v475_v7 = vpop.f32.mrb[7].mxu1 }
 0x15e   :  { %v2094_v46 = vpop.eup %2093 }
 0x15f   :  { %v2096_v47 = vpop.eup %2095  ;;  %v1026_v48 = vsel %vm834_vm0, %v2094_v46, 0.0  ;;  %v399_v2 = vpop.f32.mrb[8].mxu0 }
 0x160   :  { %v898_v49 = vadd.f32 %v2096_v47, %v2094_v46  ;;  %v1027_v50 = vsel %vm835_vm1, %v2096_v47, 0.0  ;;  %v401_v4 = vpop.f32.mrb[9].mxu0  ;;  %v479_v8 = vpop.f32.mrb[8].mxu1 }
 0x161   :  { %v1090_v51 = vadd.f32 %v1027_v50, %v1026_v48  ;;  %v403_v6 = vpop.f32.mrb[10].mxu0  ;;  %v481_v10 = vpop.f32.mrb[9].mxu1 }
 0x162   :  { %899 = vadd.xlane.f32.xlu0 %v898_v49  ;;  %v405_v0 = vpop.f32.mrb[11].mxu0  ;;  %v483_v12 = vpop.f32.mrb[10].mxu1 }
 0x163   :  { %1091 = vadd.xlane.f32.xlu1 %v1090_v51  ;;  %v485_v14 = vpop.f32.mrb[11].mxu1  ;;  %v2098_v41 = vpop.eup %2097 }
 0x167   :  { %v409_v9 = vpop.f32.mrb[12].mxu0 }
 0x168   :  { %v411_v11 = vpop.f32.mrb[13].mxu0  ;;  %v489_v16 = vpop.f32.mrb[12].mxu1 }
 0x169   :  { %v413_v13 = vpop.f32.mrb[14].mxu0  ;;  %v491_v18 = vpop.f32.mrb[13].mxu1 }
 0x16a   :  { %v415_v15 = vpop.f32.mrb[15].mxu0  ;;  %v493_v20 = vpop.f32.mrb[14].mxu1  ;;  %v1839_v13 = vand.u32 127, %v826_v30 }
 0x16b   :  { %v495_v22 = vpop.f32.mrb[15].mxu1 }
 0x16c   :  { %vm1841_vm4 = vcmp.eq.s32.totalorder %v1839_v13, 0 }
 0x16d   :  { %vm1842_vm5 = vmand %vm1840_vm3, %vm1841_vm4 }
 0x16f   :  { %v419_v17 = vpop.f32.mrb[16].mxu0 }
 0x170   :  { %v421_v19 = vpop.f32.mrb[17].mxu0  ;;  %v499_v24 = vpop.f32.mrb[16].mxu1 }
 0x171   :  { %v423_v21 = vpop.f32.mrb[18].mxu0  ;;  %v501_v27 = vpop.f32.mrb[17].mxu1 }
 0x172   :  { %v425_v23 = vpop.f32.mrb[19].mxu0  ;;  %v503_v29 = vpop.f32.mrb[18].mxu1 }
 0x173   :  { %v505_v32 = vpop.f32.mrb[19].mxu1 }
 0x177   :  { %v429_v25 = vpop.f32.mrb[20].mxu0 }
 0x178   :  { %v431_v28 = vpop.f32.mrb[21].mxu0  ;;  %v509_v37 = vpop.f32.mrb[20].mxu1 }
 0x179   :  { %v433_v31 = vpop.f32.mrb[22].mxu0  ;;  %v511_v38 = vpop.f32.mrb[21].mxu1 }
 0x17a   :  { %v435_v33 = vpop.f32.mrb[23].mxu0  ;;  %v513_v39 = vpop.f32.mrb[22].mxu1 }
 0x17b   :  { %v515_v40 = vpop.f32.mrb[23].mxu1 }
 0x17f   :  { %v439_v54 = vpop.f32.mrb[24].mxu0 }
 0x180   :  { %v519_v55 = vpop.f32.mrb[24].mxu1  ;;  %v441_v56 = vpop.f32.mrb[25].mxu0 }
 0x181   :  { %v521_v57 = vpop.f32.mrb[25].mxu1  ;;  %v443_v58 = vpop.f32.mrb[26].mxu0 }
 0x182   :  { %v523_v59 = vpop.f32.mrb[26].mxu1  ;;  %v445_v60 = vpop.f32.mrb[27].mxu0 }
 0x183   :  { %v525_v61 = vpop.f32.mrb[27].mxu1 }
 0x187   :  { %v449_v62 = vpop.f32.mrb[28].mxu0 }
 0x188   :  { %v529_v63 = vpop.f32.mrb[28].mxu1  ;;  %v451_v1 = vpop.f32.mrb[29].mxu0 }
 0x189   :  { %v531_v2 = vpop.f32.mrb[29].mxu1  ;;  %v453_v3 = vpop.f32.mrb[30].mxu0 }
 0x18a   :  { %v533_v4 = vpop.f32.mrb[30].mxu1  ;;  %v455_v5 = vpop.f32.mrb[31].mxu0 }
 0x18b   :  { %v535_v6 = vpop.f32.mrb[31].mxu1 }
 0x1ef   :  { %v900_v42 = vpop.xlane.xlu0 %899 }
 0x1f0   :  { %v1959_v43 = vadd.f32 -150.4196, %v900_v42  ;;  %v1092_v44 = vpop.xlane.xlu1 %1091 }
 0x1f1   :  { %v1378_v45 = vsub.f32 %v1092_v44, %v2098_v41 }
 0x1f2   :  { %v1410_v46 = vsub.f32 %v1959_v43, %v1092_v44 }
 0x1f3   :  { %v1541_v47 = vsub.f32 0.0, %v1378_v45 }
 0x1f4   :  { %2099 = vlog2.f32 %v1410_v46 }
 0x1f5   :  { %2101 = vlog2.f32 %v1541_v47 }
 0x1fe   :  { %v2100_v48 = vpop.eup %2099 }
 0x1ff   :  { %v2102_v49 = vpop.eup %2101  ;;  %v1638_v50 = vmul.f32 0.6931472, %v2100_v48 }
 0x200   :  { %v1574_v51 = vmul.f32 0.6931472, %v2102_v49 }
 0x202   :  { %v1701_v52 = vadd.f32 %v1638_v50, %v1574_v51 }
 0x204   :  { %v1766_v53 = vsel %vm1765_vm2, %v1701_v52, 0.0 }
 0x205   :  { %1829 = vadd.xlane.f32.xlu1 %v1766_v53 }
 0x292   :  { %v1830_v7 = vpop.xlane.xlu1 %1829 }
 0x293   :  { %v1831_v0 = vrot.slane %v1830_v7, 4 }
 0x295   :  { %v1832_v8 = vadd.f32 %v1831_v0, %v1830_v7 }
 0x297   :  { %v1833_v9 = vrot.slane %v1832_v8, 2 }
 0x299   :  { %v1834_v10 = vadd.f32 %v1833_v9, %v1832_v8 }
 0x29b   :  { %v1835_v11 = vrot.slane %v1834_v10, 1 }
 0x29d   :  { %v1836_v12 = vadd.f32 %v1835_v11, %v1834_v10 }
 0x29f   :  { %2039 = vpush %v1836_v12 }
 0x2d0   :  { %s2040_s29 = spop %2039 }
 0x2d1   :  { %v1843_v14 = vstv %s2040_s29 }
 0x2d2   :  { %v1844_v15 = vsel %vm1842_vm5, %v1843_v14, 0.0 }
 0x2d3   :  { %1845 = vst [vmem:[#allocation11] sm:$0xff] %v1844_v15 }
 0x2d4   :  { %2224 = shalt.err (!%p2221_p2)
}
 0x2d5   :  { %s2225_s8 = scalar_lea.hbm %s2394_s5, 128 }
 0x2d6   :  { %p2226_p3 = scmp.ne.s32.totalorder %s2394_s5, %s2225_s8  ;;  %p2229_p4 = scmp.lt.u32.totalorder %s2225_s8, %s2394_s5 }
 0x2d8   :  { %p2231_p5 = pnand %p2229_p4, %p2226_p3 }
 0x2da   :  { %2234 = shalt.err (!%p2231_p5)
}
 0x2db   :  { %1855 = dma.vmem_to_hbm [thread:$0]  %s1853_s28, 128, %s2394_s5, [#allocation4]  }
 0x2dc   :  { %2241 = dma.done.wait [#allocation4], 128  }
 0x2dd   :  { %2242 = vsyncadd [#allocation4], 4294967168 }
 0x2de   :  { %1859 = vsyncpa [#allocation3], 1 }
 0x2df   :  { %1860 = vsyncpa [#allocation6], 1 }
 0x2e0   :  { %1861 = vsyncpa [#allocation9], 1 }
 0x2e1   :  { %1862 = vsyncpa [#allocation4], 1 }

</bundles_post_ra>
